<compile_context>
chip_gen: v7x
topology: tpu7x:2x2x1
jax: 0.10.0
libtpu: 0.0.40
codegen_flags: <defaults>
</compile_context>

<pallas_src>
import math

import jax
import jax.numpy as jnp
from jax import lax
from jax.experimental import pallas as pl
from jax.experimental.pallas import tpu as pltpu

_LN_EPS = 1e-5  # torch.nn.LayerNorm default


def _single_buffered_kwargs():
    """Kwargs to single-buffer a grid-invariant BlockSpec (graceful fallback)."""
    try:
        pl.BlockSpec((8, 128), lambda i: (0, 0), pipeline_mode=pl.Buffered(1))
        return {"pipeline_mode": pl.Buffered(1)}
    except Exception:  # older BlockSpec without `pipeline_mode`
        return {}


_SB = _single_buffered_kwargs()


def _two_tensorcore_chip():
    """True only when the chip has 2 TensorCores (v7x-class megacore)."""
    try:
        kind = jax.devices()[0].device_kind.lower()
    except Exception:
        return False
    return ("v7" in kind) or ("7x" in kind)


def _layer_norm(h, gamma, beta):
    mu = jnp.mean(h, axis=-1, keepdims=True)
    xc = h - mu
    var = jnp.mean(xc * xc, axis=-1, keepdims=True)
    return xc * lax.rsqrt(var + _LN_EPS) * gamma + beta


def _decoder_layer_kernel(x_ref, wqkv_ref, bqkv_ref, wo_ref, bo_ref,
                          g1_ref, be1_ref, w1_ref, b1_ref, w2_ref, b2_ref,
                          g2_ref, be2_ref, cos_ref, sin_ref, out_ref):
    bt, S, D = x_ref.shape

    x = x_ref[...]                                   # (bt, S, D) f32
    x2d = x.reshape(bt * S, D)
    x_bf = x2d.astype(jnp.bfloat16)                  # bf16 MXU inputs, f32 acc

    # Separate per-segment dots (avoids lane-tile-crossing slices of a fused
    # (rows, 5D) result when D < 128); the bf16 LHS is reused across all five.
    def proj(i):
        return (jnp.dot(x_bf, wqkv_ref[i],
                        preferred_element_type=jnp.float32)
                + bqkv_ref[i]).reshape(bt, S, D)

    q, q_sw = proj(0), proj(1)   # 1/sqrt(d_k) folded into the Q path host-side
    k, k_sw = proj(2), proj(3)   # signed pair-swap folded via host-side rot
    v = proj(4)

    cos = cos_ref[...]                               # (S, D) pair-repeated
    sin = sin_ref[...]

    # Interleaved RoPE:
    #   q_rot[2i]   = q[2i]*cos[i] - q[2i+1]*sin[i]
    #   q_rot[2i+1] = q[2i]*sin[i] + q[2i+1]*cos[i]
    # with the signed pair-swap already baked into q_sw / k_sw.
    # TODO(synk): for D >= 128 drop the q_sw/k_sw projections and do the swap
    # in-kernel with pltpu.roll(+/-1, axis=-1) + lane-parity select instead.
    q_rot = q * cos + q_sw * sin
    k_rot = k * cos + k_sw * sin

    # Single head (num_heads == 1 asserted in the wrapper), mask=None path.
    # TODO(synk): num_heads > 1 and the optional attention mask are not
    # implemented (H>1 breaks the module's RoPE broadcast).
    s = jnp.einsum('bqd,bkd->bqk',
                   q_rot.astype(jnp.bfloat16), k_rot.astype(jnp.bfloat16),
                   preferred_element_type=jnp.float32)            # (bt, S, S)
    m = jnp.max(s, axis=-1, keepdims=True)
    e = jnp.exp(s - m)
    inv = pl.reciprocal(jnp.sum(e, axis=-1, keepdims=True), approx=True)  # EUP
    attn = e * inv
    ctx = jnp.einsum('bqk,bkd->bqd',
                     attn.astype(jnp.bfloat16), v.astype(jnp.bfloat16),
                     preferred_element_type=jnp.float32)          # (bt, S, D)

    attn_out = jnp.dot(ctx.reshape(bt * S, D).astype(jnp.bfloat16), wo_ref[...],
                       preferred_element_type=jnp.float32) + bo_ref[...]

    # Residual + LayerNorm1 (dropout == identity in eval mode).
    h = _layer_norm(x2d + attn_out, g1_ref[...], be1_ref[...])

    # FeedForward: relu(h @ W1.T + b1) @ W2.T + b2
    ff = jnp.maximum(
        jnp.dot(h.astype(jnp.bfloat16), w1_ref[...],
                preferred_element_type=jnp.float32) + b1_ref[...], 0.0)
    ff = jnp.dot(ff.astype(jnp.bfloat16), w2_ref[...],
                 preferred_element_type=jnp.float32) + b2_ref[...]

    # Residual + LayerNorm2.
    y = _layer_norm(h + ff, g2_ref[...], be2_ref[...])
    out_ref[...] = y.reshape(bt, S, D).astype(out_ref.dtype)


def decoder_layer(x, position_ids, params, num_heads):
    B, S, D = x.shape
    F = params["w1"].shape[0]
    assert D % num_heads == 0
    d_k = D // num_heads
    assert d_k == D, "exact PyTorch RoPE broadcast requires num_heads == 1"

    # ---- grid / tile selection ------------------------------------------
    # 1 TC (v5e/v6e): grid is a serial loop -> one big batch-folded step.
    # 2 TC (v7x): split the batch in two and shard across cores.
    n_chunks = 2 if (_two_tensorcore_chip() and B % 2 == 0 and B >= 2) else 1

    # Cap bt so the (bt,S,S) f32 scores + f32 activations stay well inside a
    # single TC's VMEM (v7x: 64 MiB physical, ~32 MiB default scoped limit).
    budget = 20 * 1024 * 1024

    def _act_bytes(b):
        return 4 * (b * S * S + b * S * (6 * D + 2 * F))

    bt = max(B // n_chunks, 1)
    while bt > 1 and (B % bt != 0 or _act_bytes(bt) > budget):
        bt -= 1
    grid = (B // bt,)

    if n_chunks == 2 and grid[0] == 2:
        semantics = (pltpu.CORE_PARALLEL,)     # actually shard across the 2 TCs
    else:
        semantics = ("arbitrary",)

    # ---- host-side (trace-time) constant folding -------------------------
    theta = 10000.0 ** (-2.0 * jnp.arange(0, D // 2, dtype=jnp.float32) / D)
    angles = position_ids.astype(jnp.float32)[:, None] * theta[None, :]  # (S, D//2)
    cos_rep = jnp.repeat(jnp.cos(angles), 2, axis=-1)                    # (S, D)
    sin_rep = jnp.repeat(jnp.sin(angles), 2, axis=-1)                    # (S, D)

    idx = jnp.arange(D // 2)
    rot = jnp.zeros((D, D), jnp.float32)
    rot = rot.at[2 * idx, 2 * idx + 1].set(1.0)    # rot(q)[2i+1] =  q[2i]
    rot = rot.at[2 * idx + 1, 2 * idx].set(-1.0)   # rot(q)[2i]   = -q[2i+1]

    scale = 1.0 / math.sqrt(d_k)
    wq_t = params["wq"].T * scale                  # scale folded into Q path
    bq_s = params["bq"] * scale
    wk_t = params["wk"].T
    # Stacked per-segment projection weights (fold scale + pair-swap in f32,
    # then cast to bf16 for the MXU).
    wqkv = jnp.stack([wq_t, wq_t @ rot, wk_t, wk_t @ rot,
                      params["wv"].T]).astype(jnp.bfloat16)          # (5, D, D)
    bqkv = jnp.stack([bq_s, bq_s @ rot, params["bk"],
                      params["bk"] @ rot, params["bv"]])[:, None, :]  # (5,1,D)

    wo = params["wo"].T.astype(jnp.bfloat16)       # (D, D)
    w1 = params["w1"].T.astype(jnp.bfloat16)       # (D, F)
    w2 = params["w2"].T.astype(jnp.bfloat16)       # (F, D)

    # ---- BlockSpecs -------------------------------------------------------
    def const_spec(shape):
        zeros = (0,) * len(shape)
        return pl.BlockSpec(shape, lambda c: zeros, **_SB)   # single-buffered

    x_spec = pl.BlockSpec((bt, S, D), lambda c: (c, 0, 0))
    out_spec = pl.BlockSpec((bt, S, D), lambda c: (c, 0, 0))

    grid_spec = pltpu.PrefetchScalarGridSpec(
        num_scalar_prefetch=0,
        grid=grid,
        in_specs=[
            x_spec,
            const_spec((5, D, D)), const_spec((5, 1, D)),   # QKV(+rot) proj
            const_spec((D, D)), const_spec((1, D)),         # W_o, b_o
            const_spec((1, D)), const_spec((1, D)),         # LN1 gamma/beta
            const_spec((D, F)), const_spec((1, F)),         # FFN linear1
            const_spec((F, D)), const_spec((1, D)),         # FFN linear2
            const_spec((1, D)), const_spec((1, D)),         # LN2 gamma/beta
            const_spec((S, D)), const_spec((S, D)),         # cos / sin tables
        ],
        out_specs=out_spec,
    )

    # Only raise the scoped-VMEM limit when the estimate actually needs it.
    weight_bytes = 2 * (wqkv.size + wo.size + w1.size + w2.size) \
        + 4 * (bqkv.size + 6 * D + F + 2 * S * D)
    io_bytes = 2 * 2 * bt * S * D * 4
    vmem_est = weight_bytes + _act_bytes(bt) + io_bytes
    cp_kwargs = dict(dimension_semantics=semantics)
    if vmem_est > 12 * 1024 * 1024:
        cp_kwargs["vmem_limit_bytes"] = int(min(2 * vmem_est, 64 * 1024 * 1024))

    return pl.pallas_call(
        _decoder_layer_kernel,
        grid_spec=grid_spec,
        out_shape=jax.ShapeDtypeStruct((B, S, D), jnp.float32),
        compiler_params=pltpu.CompilerParams(**cp_kwargs),
    )(x, wqkv, bqkv,
      wo, params["bo"][None, :],
      params["g1"][None, :], params["be1"][None, :],
      w1, params["b1"][None, :],
      w2, params["b2"][None, :],
      params["g2"][None, :], params["be2"][None, :],
      cos_rep, sin_rep)


def reference(x, position_ids, params, num_heads):
    """Pure-JAX f32 reference reproducing the PyTorch DecoderLayer forward
    exactly (dropout = identity)."""
    B, S, D = x.shape
    d_k = D // num_heads
    q = x @ params["wq"].T + params["bq"]
    k = x @ params["wk"].T + params["bk"]
    v = x @ params["wv"].T + params["bv"]
    q = q.reshape(B, S, num_heads, d_k).transpose(0, 2, 1, 3)
    k = k.reshape(B, S, num_heads, d_k).transpose(0, 2, 1, 3)
    v = v.reshape(B, S, num_heads, d_k).transpose(0, 2, 1, 3)

    theta = 10000.0 ** (-2.0 * jnp.arange(0, D // 2, dtype=jnp.float32) / D)
    angles = position_ids.astype(jnp.float32)[:, None] * theta
    c, s = jnp.cos(angles), jnp.sin(angles)

    def rope(t):
        te, to = t[..., 0::2], t[..., 1::2]
        re = te * c - to * s
        ro = te * s + to * c
        return jnp.stack([re, ro], axis=-1).reshape(t.shape)

    q, k = rope(q), rope(k)
    scores = q @ jnp.swapaxes(k, -1, -2) / math.sqrt(d_k)
    attn = jax.nn.softmax(scores, axis=-1)
    out = (attn @ v).transpose(0, 2, 1, 3).reshape(B, S, D)
    attn_out = out @ params["wo"].T + params["bo"]

    def ln(h, g, b):
        mu = jnp.mean(h, -1, keepdims=True)
        var = jnp.mean((h - mu) ** 2, -1, keepdims=True)
        return (h - mu) / jnp.sqrt(var + _LN_EPS) * g + b

    h = ln(x + attn_out, params["g1"], params["be1"])
    ff = jnp.maximum(h @ params["w1"].T + params["b1"], 0.0) @ params["w2"].T + params["b2"]
    return ln(h + ff, params["g2"], params["be2"])


if __name__ == "__main__":
    B, S, D, H, F = 2, 8, 32, 1, 64   # H=1 required by the module's RoPE broadcast

    key = jax.random.PRNGKey(0)
    keys = jax.random.split(key, 20)
    bound = 1.0 / math.sqrt(D)
    bound_f = 1.0 / math.sqrt(F)

    def u(k, shape, b):
        return jax.random.uniform(k, shape, jnp.float32, -b, b)

    params = dict(
        wq=u(keys[0], (D, D), bound), bq=u(keys[1], (D,), bound),
        wk=u(keys[2], (D, D), bound), bk=u(keys[3], (D,), bound),
        wv=u(keys[4], (D, D), bound), bv=u(keys[5], (D,), bound),
        wo=u(keys[6], (D, D), bound), bo=u(keys[7], (D,), bound),
        w1=u(keys[8], (F, D), bound), b1=u(keys[9], (F,), bound),
        w2=u(keys[10], (D, F), bound_f), b2=u(keys[11], (D,), bound_f),
        g1=1.0 + 0.1 * jax.random.normal(keys[12], (D,), jnp.float32),
        be1=0.1 * jax.random.normal(keys[13], (D,), jnp.float32),
        g2=1.0 + 0.1 * jax.random.normal(keys[14], (D,), jnp.float32),
        be2=0.1 * jax.random.normal(keys[15], (D,), jnp.float32),
    )

    x = jax.random.normal(keys[16], (B, S, D), jnp.float32)
    position_ids = jnp.arange(S, dtype=jnp.float32)

    out = decoder_layer(x, position_ids, params, H)
    out = jax.block_until_ready(out)

    ref_out = reference(x, position_ids, params, H)
    assert out.shape == (B, S, D)
    # bf16 MXU operands + approx EUP reciprocal -> relaxed tolerance vs f32 ref.
    err = float(jnp.max(jnp.abs(out - ref_out)))
    assert jnp.allclose(out, ref_out, atol=5e-2, rtol=5e-2), err

    print("KERNEL_OK")
</pallas_src>

<mosaic_0001>
module attributes {stable_mosaic.version = 11 : i64} {
  func.func @_decoder_layer_kernel(%arg0: i32, %arg1: memref<2x8x32xf32, #tpu.memory_space<vmem>>, %arg2: memref<5x32x32xbf16, #tpu.memory_space<vmem>>, %arg3: memref<5x1x32xf32, #tpu.memory_space<vmem>>, %arg4: memref<32x32xbf16, #tpu.memory_space<vmem>>, %arg5: memref<1x32xf32, #tpu.memory_space<vmem>>, %arg6: memref<1x32xf32, #tpu.memory_space<vmem>>, %arg7: memref<1x32xf32, #tpu.memory_space<vmem>>, %arg8: memref<32x64xbf16, #tpu.memory_space<vmem>>, %arg9: memref<1x64xf32, #tpu.memory_space<vmem>>, %arg10: memref<64x32xbf16, #tpu.memory_space<vmem>>, %arg11: memref<1x32xf32, #tpu.memory_space<vmem>>, %arg12: memref<1x32xf32, #tpu.memory_space<vmem>>, %arg13: memref<1x32xf32, #tpu.memory_space<vmem>>, %arg14: memref<8x32xf32, #tpu.memory_space<vmem>>, %arg15: memref<8x32xf32, #tpu.memory_space<vmem>>, %arg16: memref<2x8x32xf32, #tpu.memory_space<vmem>>) attributes {dimension_semantics = [#tpu.dimension_semantics<arbitrary>], iteration_bounds = array<i64: 1>, scalar_prefetch = 0 : i64, scratch_operands = 0 : i64, tpu.core_type = #tpu.core_type<tc>, window_params = [{transform_indices = @transform_0, window_bounds = array<i64: 2, 8, 32>}, {pipeline_mode = #tpu.pipeline_mode<synchronous>, transform_indices = @transform_1, window_bounds = array<i64: 5, 32, 32>}, {pipeline_mode = #tpu.pipeline_mode<synchronous>, transform_indices = @transform_2, window_bounds = array<i64: 5, 1, 32>}, {pipeline_mode = #tpu.pipeline_mode<synchronous>, transform_indices = @transform_3, window_bounds = array<i64: 32, 32>}, {pipeline_mode = #tpu.pipeline_mode<synchronous>, transform_indices = @transform_4, window_bounds = array<i64: 1, 32>}, {pipeline_mode = #tpu.pipeline_mode<synchronous>, transform_indices = @transform_5, window_bounds = array<i64: 1, 32>}, {pipeline_mode = #tpu.pipeline_mode<synchronous>, transform_indices = @transform_6, window_bounds = array<i64: 1, 32>}, {pipeline_mode = #tpu.pipeline_mode<synchronous>, transform_indices = @transform_7, window_bounds = array<i64: 32, 64>}, {pipeline_mode = #tpu.pipeline_mode<synchronous>, transform_indices = @transform_8, window_bounds = array<i64: 1, 64>}, {pipeline_mode = #tpu.pipeline_mode<synchronous>, transform_indices = @transform_9, window_bounds = array<i64: 64, 32>}, {pipeline_mode = #tpu.pipeline_mode<synchronous>, transform_indices = @transform_10, window_bounds = array<i64: 1, 32>}, {pipeline_mode = #tpu.pipeline_mode<synchronous>, transform_indices = @transform_11, window_bounds = array<i64: 1, 32>}, {pipeline_mode = #tpu.pipeline_mode<synchronous>, transform_indices = @transform_12, window_bounds = array<i64: 1, 32>}, {pipeline_mode = #tpu.pipeline_mode<synchronous>, transform_indices = @transform_13, window_bounds = array<i64: 8, 32>}, {pipeline_mode = #tpu.pipeline_mode<synchronous>, transform_indices = @transform_14, window_bounds = array<i64: 8, 32>}, {transform_indices = @transform_15, window_bounds = array<i64: 2, 8, 32>}]} {
    %c0 = arith.constant 0 : index
    %c0_0 = arith.constant 0 : index
    %c0_1 = arith.constant 0 : index
    %0 = vector.load %arg1[%c0, %c0_0, %c0_1] : memref<2x8x32xf32, #tpu.memory_space<vmem>>, vector<2x8x32xf32>
    %1 = vector.shape_cast %0 : vector<2x8x32xf32> to vector<16x32xf32>
    %2 = arith.truncf %1 : vector<16x32xf32> to vector<16x32xbf16>
    %c0_2 = arith.constant 0 : index
    %c0_3 = arith.constant 0 : index
    %c0_4 = arith.constant 0 : index
    %3 = vector.load %arg2[%c0_2, %c0_3, %c0_4] : memref<5x32x32xbf16, #tpu.memory_space<vmem>>, vector<1x32x32xbf16>
    %4 = vector.shape_cast %3 : vector<1x32x32xbf16> to vector<32x32xbf16>
    %cst = arith.constant dense<0.000000e+00> : vector<16x32xf32>
    %5 = tpu.matmul %2, %4, %cst {dimension_numbers = #tpu.dot_dimension_numbers<[1], [0], [0], [1], [0, 0, 1, 1], [], []>} : vector<16x32xbf16>, vector<32x32xbf16>, vector<16x32xf32> -> vector<16x32xf32>
    %c0_5 = arith.constant 0 : index
    %c0_6 = arith.constant 0 : index
    %c0_7 = arith.constant 0 : index
    %6 = vector.load %arg3[%c0_5, %c0_6, %c0_7] : memref<5x1x32xf32, #tpu.memory_space<vmem>>, vector<1x1x32xf32>
    %7 = vector.shape_cast %6 : vector<1x1x32xf32> to vector<1x32xf32>
    %8 = vector.broadcast %7 : vector<1x32xf32> to vector<16x32xf32>
    %9 = arith.addf %5, %8 : vector<16x32xf32>
    %10 = vector.shape_cast %9 : vector<16x32xf32> to vector<2x8x32xf32>
    %c1 = arith.constant 1 : index
    %c0_8 = arith.constant 0 : index
    %c0_9 = arith.constant 0 : index
    %11 = vector.load %arg2[%c1, %c0_8, %c0_9] : memref<5x32x32xbf16, #tpu.memory_space<vmem>>, vector<1x32x32xbf16>
    %12 = vector.shape_cast %11 : vector<1x32x32xbf16> to vector<32x32xbf16>
    %cst_10 = arith.constant dense<0.000000e+00> : vector<16x32xf32>
    %13 = tpu.matmul %2, %12, %cst_10 {dimension_numbers = #tpu.dot_dimension_numbers<[1], [0], [0], [1], [0, 0, 1, 1], [], []>} : vector<16x32xbf16>, vector<32x32xbf16>, vector<16x32xf32> -> vector<16x32xf32>
    %c1_11 = arith.constant 1 : index
    %c0_12 = arith.constant 0 : index
    %c0_13 = arith.constant 0 : index
    %14 = vector.load %arg3[%c1_11, %c0_12, %c0_13] : memref<5x1x32xf32, #tpu.memory_space<vmem>>, vector<1x1x32xf32>
    %15 = vector.shape_cast %14 : vector<1x1x32xf32> to vector<1x32xf32>
    %16 = vector.broadcast %15 : vector<1x32xf32> to vector<16x32xf32>
    %17 = arith.addf %13, %16 : vector<16x32xf32>
    %18 = vector.shape_cast %17 : vector<16x32xf32> to vector<2x8x32xf32>
    %c2 = arith.constant 2 : index
    %c0_14 = arith.constant 0 : index
    %c0_15 = arith.constant 0 : index
    %19 = vector.load %arg2[%c2, %c0_14, %c0_15] : memref<5x32x32xbf16, #tpu.memory_space<vmem>>, vector<1x32x32xbf16>
    %20 = vector.shape_cast %19 : vector<1x32x32xbf16> to vector<32x32xbf16>
    %cst_16 = arith.constant dense<0.000000e+00> : vector<16x32xf32>
    %21 = tpu.matmul %2, %20, %cst_16 {dimension_numbers = #tpu.dot_dimension_numbers<[1], [0], [0], [1], [0, 0, 1, 1], [], []>} : vector<16x32xbf16>, vector<32x32xbf16>, vector<16x32xf32> -> vector<16x32xf32>
    %c2_17 = arith.constant 2 : index
    %c0_18 = arith.constant 0 : index
    %c0_19 = arith.constant 0 : index
    %22 = vector.load %arg3[%c2_17, %c0_18, %c0_19] : memref<5x1x32xf32, #tpu.memory_space<vmem>>, vector<1x1x32xf32>
    %23 = vector.shape_cast %22 : vector<1x1x32xf32> to vector<1x32xf32>
    %24 = vector.broadcast %23 : vector<1x32xf32> to vector<16x32xf32>
    %25 = arith.addf %21, %24 : vector<16x32xf32>
    %26 = vector.shape_cast %25 : vector<16x32xf32> to vector<2x8x32xf32>
    %c3 = arith.constant 3 : index
    %c0_20 = arith.constant 0 : index
    %c0_21 = arith.constant 0 : index
    %27 = vector.load %arg2[%c3, %c0_20, %c0_21] : memref<5x32x32xbf16, #tpu.memory_space<vmem>>, vector<1x32x32xbf16>
    %28 = vector.shape_cast %27 : vector<1x32x32xbf16> to vector<32x32xbf16>
    %cst_22 = arith.constant dense<0.000000e+00> : vector<16x32xf32>
    %29 = tpu.matmul %2, %28, %cst_22 {dimension_numbers = #tpu.dot_dimension_numbers<[1], [0], [0], [1], [0, 0, 1, 1], [], []>} : vector<16x32xbf16>, vector<32x32xbf16>, vector<16x32xf32> -> vector<16x32xf32>
    %c3_23 = arith.constant 3 : index
    %c0_24 = arith.constant 0 : index
    %c0_25 = arith.constant 0 : index
    %30 = vector.load %arg3[%c3_23, %c0_24, %c0_25] : memref<5x1x32xf32, #tpu.memory_space<vmem>>, vector<1x1x32xf32>
    %31 = vector.shape_cast %30 : vector<1x1x32xf32> to vector<1x32xf32>
    %32 = vector.broadcast %31 : vector<1x32xf32> to vector<16x32xf32>
    %33 = arith.addf %29, %32 : vector<16x32xf32>
    %34 = vector.shape_cast %33 : vector<16x32xf32> to vector<2x8x32xf32>
    %c4 = arith.constant 4 : index
    %c0_26 = arith.constant 0 : index
    %c0_27 = arith.constant 0 : index
    %35 = vector.load %arg2[%c4, %c0_26, %c0_27] : memref<5x32x32xbf16, #tpu.memory_space<vmem>>, vector<1x32x32xbf16>
    %36 = vector.shape_cast %35 : vector<1x32x32xbf16> to vector<32x32xbf16>
    %cst_28 = arith.constant dense<0.000000e+00> : vector<16x32xf32>
    %37 = tpu.matmul %2, %36, %cst_28 {dimension_numbers = #tpu.dot_dimension_numbers<[1], [0], [0], [1], [0, 0, 1, 1], [], []>} : vector<16x32xbf16>, vector<32x32xbf16>, vector<16x32xf32> -> vector<16x32xf32>
    %c4_29 = arith.constant 4 : index
    %c0_30 = arith.constant 0 : index
    %c0_31 = arith.constant 0 : index
    %38 = vector.load %arg3[%c4_29, %c0_30, %c0_31] : memref<5x1x32xf32, #tpu.memory_space<vmem>>, vector<1x1x32xf32>
    %39 = vector.shape_cast %38 : vector<1x1x32xf32> to vector<1x32xf32>
    %40 = vector.broadcast %39 : vector<1x32xf32> to vector<16x32xf32>
    %41 = arith.addf %37, %40 : vector<16x32xf32>
    %42 = vector.shape_cast %41 : vector<16x32xf32> to vector<2x8x32xf32>
    %c0_32 = arith.constant 0 : index
    %c0_33 = arith.constant 0 : index
    %43 = vector.load %arg14[%c0_32, %c0_33] : memref<8x32xf32, #tpu.memory_space<vmem>>, vector<8x32xf32>
    %c0_34 = arith.constant 0 : index
    %c0_35 = arith.constant 0 : index
    %44 = vector.load %arg15[%c0_34, %c0_35] : memref<8x32xf32, #tpu.memory_space<vmem>>, vector<8x32xf32>
    %45 = vector.shape_cast %43 : vector<8x32xf32> to vector<1x8x32xf32>
    %46 = vector.broadcast %45 : vector<1x8x32xf32> to vector<2x8x32xf32>
    %47 = arith.mulf %10, %46 : vector<2x8x32xf32>
    %48 = vector.shape_cast %44 : vector<8x32xf32> to vector<1x8x32xf32>
    %49 = vector.broadcast %48 : vector<1x8x32xf32> to vector<2x8x32xf32>
    %50 = arith.mulf %18, %49 : vector<2x8x32xf32>
    %51 = arith.addf %47, %50 : vector<2x8x32xf32>
    %52 = vector.shape_cast %43 : vector<8x32xf32> to vector<1x8x32xf32>
    %53 = vector.broadcast %52 : vector<1x8x32xf32> to vector<2x8x32xf32>
    %54 = arith.mulf %26, %53 : vector<2x8x32xf32>
    %55 = vector.shape_cast %44 : vector<8x32xf32> to vector<1x8x32xf32>
    %56 = vector.broadcast %55 : vector<1x8x32xf32> to vector<2x8x32xf32>
    %57 = arith.mulf %34, %56 : vector<2x8x32xf32>
    %58 = arith.addf %54, %57 : vector<2x8x32xf32>
    %59 = arith.truncf %51 : vector<2x8x32xf32> to vector<2x8x32xbf16>
    %60 = arith.truncf %58 : vector<2x8x32xf32> to vector<2x8x32xbf16>
    "tpu.trace_start"() <{level = 10 : i32, message = "bqd,bkd->bqk"}> : () -> ()
    %cst_36 = arith.constant dense<0.000000e+00> : vector<2x8x8xf32>
    %61 = tpu.matmul %59, %60, %cst_36 {dimension_numbers = #tpu.dot_dimension_numbers<[2], [2], [1], [1], [0, 0, 0, 1, 1, 1], [0], [0]>} : vector<2x8x32xbf16>, vector<2x8x32xbf16>, vector<2x8x8xf32> -> vector<2x8x8xf32>
    "tpu.trace_stop"() : () -> ()
    %cst_37 = arith.constant dense<0xFF800000> : vector<2x8xf32>
    %62 = vector.multi_reduction <maximumf>, %61, %cst_37 [2] : vector<2x8x8xf32> to vector<2x8xf32>
    %63 = vector.shape_cast %62 : vector<2x8xf32> to vector<2x8x1xf32>
    %64 = vector.broadcast %63 : vector<2x8x1xf32> to vector<2x8x8xf32>
    %65 = arith.subf %61, %64 : vector<2x8x8xf32>
    %66 = math.exp %65 : vector<2x8x8xf32>
    %cst_38 = arith.constant dense<0.000000e+00> : vector<2x8xf32>
    %67 = vector.multi_reduction <add>, %66, %cst_38 [2] : vector<2x8x8xf32> to vector<2x8xf32>
    %68 = vector.shape_cast %67 : vector<2x8xf32> to vector<2x8x1xf32>
    %69 = tpu.reciprocal %68 {approx = true} : vector<2x8x1xf32> -> vector<2x8x1xf32>
    %70 = vector.broadcast %69 : vector<2x8x1xf32> to vector<2x8x8xf32>
    %71 = arith.mulf %66, %70 : vector<2x8x8xf32>
    %72 = arith.truncf %71 : vector<2x8x8xf32> to vector<2x8x8xbf16>
    %73 = arith.truncf %42 : vector<2x8x32xf32> to vector<2x8x32xbf16>
    "tpu.trace_start"() <{level = 10 : i32, message = "bqk,bkd->bqd"}> : () -> ()
    %cst_39 = arith.constant dense<0.000000e+00> : vector<2x8x32xf32>
    %74 = tpu.matmul %72, %73, %cst_39 {dimension_numbers = #tpu.dot_dimension_numbers<[2], [1], [1], [2], [0, 0, 0, 1, 1, 2], [0], [0]>} : vector<2x8x8xbf16>, vector<2x8x32xbf16>, vector<2x8x32xf32> -> vector<2x8x32xf32>
    "tpu.trace_stop"() : () -> ()
    %75 = vector.shape_cast %74 : vector<2x8x32xf32> to vector<16x32xf32>
    %76 = arith.truncf %75 : vector<16x32xf32> to vector<16x32xbf16>
    %c0_40 = arith.constant 0 : index
    %c0_41 = arith.constant 0 : index
    %77 = vector.load %arg4[%c0_40, %c0_41] : memref<32x32xbf16, #tpu.memory_space<vmem>>, vector<32x32xbf16>
    %cst_42 = arith.constant dense<0.000000e+00> : vector<16x32xf32>
    %78 = tpu.matmul %76, %77, %cst_42 {dimension_numbers = #tpu.dot_dimension_numbers<[1], [0], [0], [1], [0, 0, 1, 1], [], []>} : vector<16x32xbf16>, vector<32x32xbf16>, vector<16x32xf32> -> vector<16x32xf32>
    %c0_43 = arith.constant 0 : index
    %c0_44 = arith.constant 0 : index
    %79 = vector.load %arg5[%c0_43, %c0_44] : memref<1x32xf32, #tpu.memory_space<vmem>>, vector<1x32xf32>
    %80 = vector.broadcast %79 : vector<1x32xf32> to vector<16x32xf32>
    %81 = arith.addf %78, %80 : vector<16x32xf32>
    %82 = arith.addf %1, %81 : vector<16x32xf32>
    %c0_45 = arith.constant 0 : index
    %c0_46 = arith.constant 0 : index
    %83 = vector.load %arg6[%c0_45, %c0_46] : memref<1x32xf32, #tpu.memory_space<vmem>>, vector<1x32xf32>
    %c0_47 = arith.constant 0 : index
    %c0_48 = arith.constant 0 : index
    %84 = vector.load %arg7[%c0_47, %c0_48] : memref<1x32xf32, #tpu.memory_space<vmem>>, vector<1x32xf32>
    %cst_49 = arith.constant dense<0.000000e+00> : vector<16xf32>
    %85 = vector.multi_reduction <add>, %82, %cst_49 [1] : vector<16x32xf32> to vector<16xf32>
    %86 = vector.shape_cast %85 : vector<16xf32> to vector<16x1xf32>
    %cst_50 = arith.constant 3.200000e+01 : f32
    %87 = vector.broadcast %cst_50 : f32 to vector<16x1xf32>
    %88 = arith.divf %86, %87 : vector<16x1xf32>
    %89 = vector.broadcast %88 : vector<16x1xf32> to vector<16x32xf32>
    %90 = arith.subf %82, %89 : vector<16x32xf32>
    %91 = arith.mulf %90, %90 : vector<16x32xf32>
    %cst_51 = arith.constant dense<0.000000e+00> : vector<16xf32>
    %92 = vector.multi_reduction <add>, %91, %cst_51 [1] : vector<16x32xf32> to vector<16xf32>
    %93 = vector.shape_cast %92 : vector<16xf32> to vector<16x1xf32>
    %cst_52 = arith.constant 3.200000e+01 : f32
    %94 = vector.broadcast %cst_52 : f32 to vector<16x1xf32>
    %95 = arith.divf %93, %94 : vector<16x1xf32>
    %cst_53 = arith.constant 9.99999974E-6 : f32
    %96 = vector.broadcast %cst_53 : f32 to vector<16x1xf32>
    %97 = arith.addf %95, %96 : vector<16x1xf32>
    %98 = math.rsqrt %97 : vector<16x1xf32>
    %99 = vector.broadcast %98 : vector<16x1xf32> to vector<16x32xf32>
    %100 = arith.mulf %90, %99 : vector<16x32xf32>
    %101 = vector.broadcast %83 : vector<1x32xf32> to vector<16x32xf32>
    %102 = arith.mulf %100, %101 : vector<16x32xf32>
    %103 = vector.broadcast %84 : vector<1x32xf32> to vector<16x32xf32>
    %104 = arith.addf %102, %103 : vector<16x32xf32>
    %105 = arith.truncf %104 : vector<16x32xf32> to vector<16x32xbf16>
    %c0_54 = arith.constant 0 : index
    %c0_55 = arith.constant 0 : index
    %106 = vector.load %arg8[%c0_54, %c0_55] : memref<32x64xbf16, #tpu.memory_space<vmem>>, vector<32x64xbf16>
    %cst_56 = arith.constant dense<0.000000e+00> : vector<16x64xf32>
    %107 = tpu.matmul %105, %106, %cst_56 {dimension_numbers = #tpu.dot_dimension_numbers<[1], [0], [0], [1], [0, 0, 1, 1], [], []>} : vector<16x32xbf16>, vector<32x64xbf16>, vector<16x64xf32> -> vector<16x64xf32>
    %c0_57 = arith.constant 0 : index
    %c0_58 = arith.constant 0 : index
    %108 = vector.load %arg9[%c0_57, %c0_58] : memref<1x64xf32, #tpu.memory_space<vmem>>, vector<1x64xf32>
    %109 = vector.broadcast %108 : vector<1x64xf32> to vector<16x64xf32>
    %110 = arith.addf %107, %109 : vector<16x64xf32>
    %cst_59 = arith.constant 0.000000e+00 : f32
    %111 = vector.broadcast %cst_59 : f32 to vector<16x64xf32>
    %112 = arith.maximumf %110, %111 : vector<16x64xf32>
    %113 = arith.truncf %112 : vector<16x64xf32> to vector<16x64xbf16>
    %c0_60 = arith.constant 0 : index
    %c0_61 = arith.constant 0 : index
    %114 = vector.load %arg10[%c0_60, %c0_61] : memref<64x32xbf16, #tpu.memory_space<vmem>>, vector<64x32xbf16>
    %cst_62 = arith.constant dense<0.000000e+00> : vector<16x32xf32>
    %115 = tpu.matmul %113, %114, %cst_62 {dimension_numbers = #tpu.dot_dimension_numbers<[1], [0], [0], [1], [0, 0, 1, 1], [], []>} : vector<16x64xbf16>, vector<64x32xbf16>, vector<16x32xf32> -> vector<16x32xf32>
    %c0_63 = arith.constant 0 : index
    %c0_64 = arith.constant 0 : index
    %116 = vector.load %arg11[%c0_63, %c0_64] : memref<1x32xf32, #tpu.memory_space<vmem>>, vector<1x32xf32>
    %117 = vector.broadcast %116 : vector<1x32xf32> to vector<16x32xf32>
    %118 = arith.addf %115, %117 : vector<16x32xf32>
    %119 = arith.addf %104, %118 : vector<16x32xf32>
    %c0_65 = arith.constant 0 : index
    %c0_66 = arith.constant 0 : index
    %120 = vector.load %arg12[%c0_65, %c0_66] : memref<1x32xf32, #tpu.memory_space<vmem>>, vector<1x32xf32>
    %c0_67 = arith.constant 0 : index
    %c0_68 = arith.constant 0 : index
    %121 = vector.load %arg13[%c0_67, %c0_68] : memref<1x32xf32, #tpu.memory_space<vmem>>, vector<1x32xf32>
    %cst_69 = arith.constant dense<0.000000e+00> : vector<16xf32>
    %122 = vector.multi_reduction <add>, %119, %cst_69 [1] : vector<16x32xf32> to vector<16xf32>
    %123 = vector.shape_cast %122 : vector<16xf32> to vector<16x1xf32>
    %cst_70 = arith.constant 3.200000e+01 : f32
    %124 = vector.broadcast %cst_70 : f32 to vector<16x1xf32>
    %125 = arith.divf %123, %124 : vector<16x1xf32>
    %126 = vector.broadcast %125 : vector<16x1xf32> to vector<16x32xf32>
    %127 = arith.subf %119, %126 : vector<16x32xf32>
    %128 = arith.mulf %127, %127 : vector<16x32xf32>
    %cst_71 = arith.constant dense<0.000000e+00> : vector<16xf32>
    %129 = vector.multi_reduction <add>, %128, %cst_71 [1] : vector<16x32xf32> to vector<16xf32>
    %130 = vector.shape_cast %129 : vector<16xf32> to vector<16x1xf32>
    %cst_72 = arith.constant 3.200000e+01 : f32
    %131 = vector.broadcast %cst_72 : f32 to vector<16x1xf32>
    %132 = arith.divf %130, %131 : vector<16x1xf32>
    %cst_73 = arith.constant 9.99999974E-6 : f32
    %133 = vector.broadcast %cst_73 : f32 to vector<16x1xf32>
    %134 = arith.addf %132, %133 : vector<16x1xf32>
    %135 = math.rsqrt %134 : vector<16x1xf32>
    %136 = vector.broadcast %135 : vector<16x1xf32> to vector<16x32xf32>
    %137 = arith.mulf %127, %136 : vector<16x32xf32>
    %138 = vector.broadcast %120 : vector<1x32xf32> to vector<16x32xf32>
    %139 = arith.mulf %137, %138 : vector<16x32xf32>
    %140 = vector.broadcast %121 : vector<1x32xf32> to vector<16x32xf32>
    %141 = arith.addf %139, %140 : vector<16x32xf32>
    %142 = vector.shape_cast %141 : vector<16x32xf32> to vector<2x8x32xf32>
    %c0_74 = arith.constant 0 : index
    %c0_75 = arith.constant 0 : index
    %c0_76 = arith.constant 0 : index
    %143 = vector.load %arg16[%c0_74, %c0_75, %c0_76] : memref<2x8x32xf32, #tpu.memory_space<vmem>>, vector<2x8x32xf32>
    tpu.vector_store %arg16[%c0_74, %c0_75, %c0_76], %142 {strides = array<i32>} : memref<2x8x32xf32, #tpu.memory_space<vmem>>, vector<2x8x32xf32>,
    return
  }
  func.func @transform_0(%arg0: i32) -> (i32, i32, i32) {
    %c0_i32 = arith.constant 0 : i32
    %c0_i32_0 = arith.constant 0 : i32
    %c0_i32_1 = arith.constant 0 : i32
    return %arg0, %c0_i32, %c0_i32_0 : i32, i32, i32
  }
  func.func @transform_1(%arg0: i32) -> (i32, i32, i32) {
    %c0_i32 = arith.constant 0 : i32
    %c0_i32_0 = arith.constant 0 : i32
    %c0_i32_1 = arith.constant 0 : i32
    %c0_i32_2 = arith.constant 0 : i32
    return %c0_i32, %c0_i32_0, %c0_i32_1 : i32, i32, i32
  }
  func.func @transform_2(%arg0: i32) -> (i32, i32, i32) {
    %c0_i32 = arith.constant 0 : i32
    %c0_i32_0 = arith.constant 0 : i32
    %c0_i32_1 = arith.constant 0 : i32
    %c0_i32_2 = arith.constant 0 : i32
    return %c0_i32, %c0_i32_0, %c0_i32_1 : i32, i32, i32
  }
  func.func @transform_3(%arg0: i32) -> (i32, i32) {
    %c0_i32 = arith.constant 0 : i32
    %c0_i32_0 = arith.constant 0 : i32
    %c0_i32_1 = arith.constant 0 : i32
    return %c0_i32, %c0_i32_0 : i32, i32
  }
  func.func @transform_4(%arg0: i32) -> (i32, i32) {
    %c0_i32 = arith.constant 0 : i32
    %c0_i32_0 = arith.constant 0 : i32
    %c0_i32_1 = arith.constant 0 : i32
    return %c0_i32, %c0_i32_0 : i32, i32
  }
  func.func @transform_5(%arg0: i32) -> (i32, i32) {
    %c0_i32 = arith.constant 0 : i32
    %c0_i32_0 = arith.constant 0 : i32
    %c0_i32_1 = arith.constant 0 : i32
    return %c0_i32, %c0_i32_0 : i32, i32
  }
  func.func @transform_6(%arg0: i32) -> (i32, i32) {
    %c0_i32 = arith.constant 0 : i32
    %c0_i32_0 = arith.constant 0 : i32
    %c0_i32_1 = arith.constant 0 : i32
    return %c0_i32, %c0_i32_0 : i32, i32
  }
  func.func @transform_7(%arg0: i32) -> (i32, i32) {
    %c0_i32 = arith.constant 0 : i32
    %c0_i32_0 = arith.constant 0 : i32
    %c0_i32_1 = arith.constant 0 : i32
    return %c0_i32, %c0_i32_0 : i32, i32
  }
  func.func @transform_8(%arg0: i32) -> (i32, i32) {
    %c0_i32 = arith.constant 0 : i32
    %c0_i32_0 = arith.constant 0 : i32
    %c0_i32_1 = arith.constant 0 : i32
    return %c0_i32, %c0_i32_0 : i32, i32
  }
  func.func @transform_9(%arg0: i32) -> (i32, i32) {
    %c0_i32 = arith.constant 0 : i32
    %c0_i32_0 = arith.constant 0 : i32
    %c0_i32_1 = arith.constant 0 : i32
    return %c0_i32, %c0_i32_0 : i32, i32
  }
  func.func @transform_10(%arg0: i32) -> (i32, i32) {
    %c0_i32 = arith.constant 0 : i32
    %c0_i32_0 = arith.constant 0 : i32
    %c0_i32_1 = arith.constant 0 : i32
    return %c0_i32, %c0_i32_0 : i32, i32
  }
  func.func @transform_11(%arg0: i32) -> (i32, i32) {
    %c0_i32 = arith.constant 0 : i32
    %c0_i32_0 = arith.constant 0 : i32
    %c0_i32_1 = arith.constant 0 : i32
    return %c0_i32, %c0_i32_0 : i32, i32
  }
  func.func @transform_12(%arg0: i32) -> (i32, i32) {
    %c0_i32 = arith.constant 0 : i32
    %c0_i32_0 = arith.constant 0 : i32
    %c0_i32_1 = arith.constant 0 : i32
    return %c0_i32, %c0_i32_0 : i32, i32
  }
  func.func @transform_13(%arg0: i32) -> (i32, i32) {
    %c0_i32 = arith.constant 0 : i32
    %c0_i32_0 = arith.constant 0 : i32
    %c0_i32_1 = arith.constant 0 : i32
    return %c0_i32, %c0_i32_0 : i32, i32
  }
  func.func @transform_14(%arg0: i32) -> (i32, i32) {
    %c0_i32 = arith.constant 0 : i32
    %c0_i32_0 = arith.constant 0 : i32
    %c0_i32_1 = arith.constant 0 : i32
    return %c0_i32, %c0_i32_0 : i32, i32
  }
  func.func @transform_15(%arg0: i32) -> (i32, i32, i32) {
    %c0_i32 = arith.constant 0 : i32
    %c0_i32_0 = arith.constant 0 : i32
    %c0_i32_1 = arith.constant 0 : i32
    return %arg0, %c0_i32, %c0_i32_0 : i32, i32, i32
  }
}

</mosaic_0001>

<bundles_post_ra>
// kernel: tpu_custom_call.1
= control target key start
LH: loop header
LB: loop body
LE: loop exit
PB: predicated region body
PF: predicated region fallthrough
CT: control target
= control target key end

     0   :  { %20 = vsyncpa [#allocation3], 0  ;;  %s1623_s0 = inlined_call_operand.vmem [shape: f32[2,8,32], index: 0, kind: input, shape index: {}]   ;;  %s1624_s1 = inlined_call_operand.hbm [shape: bf16[5,32,32], index: 1, kind: input, shape index: {}]   ;;  %s1625_s2 = inlined_call_operand.hbm [shape: f32[5,1,32], index: 2, kind: input, shape index: {}]   ;;  %s1626_s3 = inlined_call_operand.vmem [shape: bf16[32,32], index: 3, kind: input, shape index: {}]   ;;  %s1627_s4 = inlined_call_operand.vmem [shape: f32[1,32], index: 4, kind: input, shape index: {}]   ;;  %s1628_s5 = inlined_call_operand.vmem [shape: f32[1,32], index: 5, kind: input, shape index: {}]   ;;  %s1629_s6 = inlined_call_operand.hbm [shape: f32[1,32], index: 6, kind: input, shape index: {}]   ;;  %s1630_s7 = inlined_call_operand.vmem [shape: bf16[32,64], index: 7, kind: input, shape index: {}]   ;;  %s1631_s8 = inlined_call_operand.hbm [shape: f32[1,64], index: 8, kind: input, shape index: {}]   ;;  %s1632_s9 = inlined_call_operand.vmem [shape: bf16[64,32], index: 9, kind: input, shape index: {}]   ;;  %s1633_s10 = inlined_call_operand.vmem [shape: f32[1,32], index: 10, kind: input, shape index: {}]   ;;  %s1634_s11 = inlined_call_operand.vmem [shape: f32[1,32], index: 11, kind: input, shape index: {}]   ;;  %s1635_s12 = inlined_call_operand.vmem [shape: f32[1,32], index: 12, kind: input, shape index: {}]   ;;  %s1636_s13 = inlined_call_operand.vmem [shape: f32[8,32], index: 13, kind: input, shape index: {}]   ;;  %s1637_s14 = inlined_call_operand.vmem [shape: f32[8,32], index: 14, kind: input, shape index: {}]   ;;  %s1638_s15 = inlined_call_operand.hbm [shape: f32[2,8,32], index: 15, kind: output, shape index: {}]  }
   0x1   :  { %21 = vsyncpa [#allocation6], 0 }
   0x2   :  { %22 = vsyncpa [#allocation9], 0 }
   0x3   :  { %23 = vsyncpa [#allocation4], 0  ;;  %s1338_s18 = smov [#allocation5]   ;;  %s1220_s22 = scalar_lea.hbm %s1625_s2, 80 }
   0x4   :  { %s43_s19 = sshll.u32 %s1338_s18, 4  ;;  %p1221_p0 = scmp.ne.s32.totalorder %s1625_s2, %s1220_s22  ;;  %s44_s19 = int_to_ptr.vmem [resolvable:$true] %s43_s19 }
   0x5   :  { %p1224_p1 = scmp.lt.u32.totalorder %s1220_s22, %s1625_s2 }
   0x7   :  { %p1226_p2 = pnand %p1224_p1, %p1221_p0 }
   0x9   :  { %1229 = shalt.err (!%p1226_p2)
}
   0xa   :  { %s1230_s27 = scalar_lea.vmem %s44_s19, 80  ;;  %s1234_s28 = scalar_lea.vmem %s44_s19, 96 }
   0xb   :  { %p1231_p3 = scmp.ne.s32.totalorder %s44_s19, %s1230_s27  ;;  %p1235_p4 = scmp.lt.s32.totalorder %s44_s19, %s44_s19 }
   0xc   :  { %p1236_p5 = scmp.lt.s32.totalorder %s1234_s28, %s1230_s27 }
   0xe   :  { %p1237_p6 = por %p1236_p5, %p1235_p4 }
  0x10   :  { %p1238_p7 = pnand %p1237_p6, %p1231_p3 }
  0x12   :  { %1241 = shalt.err (!%p1238_p7)
}
  0x13   :  { %s1339_s29 = smov 16   ;;  %s1340_s30 = smov 1  }
  0x14   :  { %49 = dma.hbm_to_vmem [thread:$0]  %s1625_s2, 80, %s44_s19, [#allocation6], %s1339_s29, %s1339_s29, %s1340_s30  }
  0x15   :  { %s1341_s18 = smov [#allocation2]   ;;  %s1242_s23 = scalar_lea.hbm %s1624_s1, 1280 }
  0x16   :  { %s31_s20 = sshll.u32 %s1341_s18, 4  ;;  %p1243_p8 = scmp.ne.s32.totalorder %s1624_s1, %s1242_s23  ;;  %s32_s20 = int_to_ptr.vmem [resolvable:$true] %s31_s20 }
  0x17   :  { %p1246_p9 = scmp.lt.u32.totalorder %s1242_s23, %s1624_s1 }
  0x19   :  { %p1248_p10 = pnand %p1246_p9, %p1243_p8 }
  0x1b   :  { %1251 = shalt.err (!%p1248_p10)
}
  0x1c   :  { %s1252_s28 = scalar_lea.vmem %s32_s20, 1280  ;;  %p1257_p12 = scmp.lt.s32.totalorder %s32_s20, %s32_s20 }
  0x1d   :  { %p1253_p11 = scmp.ne.s32.totalorder %s32_s20, %s1252_s28  ;;  %p1258_p13 = scmp.lt.s32.totalorder %s1252_s28, %s1252_s28 }
  0x1f   :  { %p1259_p0 = por %p1258_p13, %p1257_p12 }
  0x21   :  { %p1260_p1 = pnand %p1259_p0, %p1253_p11 }
  0x23   :  { %1263 = shalt.err (!%p1260_p1)
}
  0x24   :  { %s1342_s2 = smov 64   ;;  %s1343_s19 = smov 4  }
  0x25   :  { %37 = dma.hbm_to_vmem [thread:$0]  %s1624_s1, 1280, %s32_s20, [#allocation3], %s1342_s2, %s1342_s2, %s1343_s19  }
  0x26   :  { %s1344_s16 = smov [#allocation7]   ;;  %s1345_s18 = smov [#allocation8]  }
  0x27   :  { %s62_s17 = sshll.u32 %s1344_s16, 4  ;;  %s74_s21 = sshll.u32 %s1345_s18, 4  ;;  %s63_s17 = int_to_ptr.vmem [resolvable:$true] %s62_s17  ;;  %s75_s21 = int_to_ptr.vmem [resolvable:$true] %s74_s21 }
  0x28   :  { %s1264_s24 = scalar_lea.hbm %s1629_s6, 16 }
  0x29   :  { %p1265_p2 = scmp.ne.s32.totalorder %s1629_s6, %s1264_s24  ;;  %p1268_p3 = scmp.lt.u32.totalorder %s1264_s24, %s1629_s6 }
  0x2b   :  { %p1270_p4 = pnand %p1268_p3, %p1265_p2 }
  0x2d   :  { %1273 = shalt.err (!%p1270_p4)
}
  0x2e   :  { %s1274_s1 = scalar_lea.vmem %s63_s17, 16  ;;  %s1278_s20 = scalar_lea.vmem %s63_s17, 32 }
  0x2f   :  { %p1275_p5 = scmp.ne.s32.totalorder %s63_s17, %s1274_s1  ;;  %p1279_p6 = scmp.lt.s32.totalorder %s63_s17, %s63_s17 }
  0x30   :  { %p1280_p7 = scmp.lt.s32.totalorder %s1278_s20, %s1274_s1 }
  0x32   :  { %p1281_p8 = por %p1280_p7, %p1279_p6 }
  0x34   :  { %p1282_p9 = pnand %p1281_p8, %p1275_p5 }
  0x36   :  { %1285 = shalt.err (!%p1282_p9)
}
  0x37   :  { %65 = dma.hbm_to_vmem [thread:$0]  %s1629_s6, 16, %s63_s17, [#allocation6]  }
  0x38   :  { %s1286_s16 = scalar_lea.hbm %s1631_s8, 16 }
  0x39   :  { %p1287_p10 = scmp.ne.s32.totalorder %s1631_s8, %s1286_s16  ;;  %p1290_p11 = scmp.lt.u32.totalorder %s1286_s16, %s1631_s8 }
  0x3b   :  { %p1292_p12 = pnand %p1290_p11, %p1287_p10 }
  0x3d   :  { %1295 = shalt.err (!%p1292_p12)
}
  0x3e   :  { %s1296_s25 = scalar_lea.vmem %s75_s21, 16  ;;  %s1300_s26 = scalar_lea.vmem %s75_s21, 32 }
  0x3f   :  { %p1297_p13 = scmp.ne.s32.totalorder %s75_s21, %s1296_s25  ;;  %p1301_p0 = scmp.lt.s32.totalorder %s75_s21, %s75_s21 }
  0x40   :  { %p1302_p1 = scmp.lt.s32.totalorder %s1300_s26, %s1296_s25 }
  0x42   :  { %p1303_p2 = por %p1302_p1, %p1301_p0 }
  0x44   :  { %p1304_p3 = pnand %p1303_p2, %p1297_p13 }
  0x46   :  { %1307 = shalt.err (!%p1304_p3)
}
  0x47   :  { %77 = dma.hbm_to_vmem [thread:$0]  %s1631_s8, 16, %s75_s21, [#allocation9]  }
  0x48   :  { %1330 = dma.done.wait [#allocation3], 1280  }
  0x49   :  { %1331 = vsyncadd [#allocation3], 4294966016 }
  0x4a   :  { %1332 = dma.done.wait [#allocation6], 96  }
  0x4b   :  { %1333 = vsyncadd [#allocation6], 4294967200 }
  0x4c   :  { %1334 = dma.done.wait [#allocation9], 16  }
  0x4d   :  { %1335 = vsyncadd [#allocation9], 4294967280  ;;  %v1346_v0 = vmov 0.0   ;;  %vm1347_vm0 = vmmov 0   ;;  %v1186_v1 = vld [vmem:[#allocation2] sm:$0xff]   ;;  %v1187_v2 = vld [vmem:[#allocation2 + $0x10] sm:$0xff]  }
  0x4e   :  { %1081 = vmatprep.subr.bf16.mxu0 %v1346_v0  ;;  %1089 = vmatprep.subr.bf16.mxu1 %v1346_v0  ;;  %v1188_v3 = vld [vmem:[#allocation2 + $0x8] sm:$0xff]   ;;  %v1189_v4 = vld [vmem:[#allocation2 + $0x18] sm:$0xff]   ;;  %v1490_v5 = vld [vmem:[%s1623_s0] sm:$0xff]  ;;  %vm129_vm1 = vcmask 261120   ;;  %vm578_vm2 = vcmask 1043456   ;;  %vm548_vm3 = vcmask 64512  }
  0x4f   :  { %1085 = vmatprep.mubr.msk.bf16.mxu0 %vm1347_vm0, %v1346_v0  ;;  %1093 = vmatprep.mubr.msk.bf16.mxu1 %vm1347_vm0, %v1346_v0  ;;  %v1495_v6 = vld [vmem:[%s1623_s0 + $0x8] sm:$0xff]  ;;  %v1190_v8 = vld [vmem:[#allocation2 + $0x20] sm:$0xff]   ;;  %v1191_v9 = vld [vmem:[#allocation2 + $0x30] sm:$0xff]   ;;  %vm893_vm4 = vcmask 523264   ;;  %s1348_s20 = smov [#allocation10]  }
  0x50   :  { %1082 = vmatpush3.bf16.msra.mxu0 %v1186_v1  ;;  %1090 = vmatpush3.bf16.msra.mxu1 %v1187_v2  ;;  %v105_v7 = vpack.c.bf16 %v1495_v6, %v1490_v5  ;;  %v1192_v10 = vld [vmem:[#allocation2 + $0x28] sm:$0xff]   ;;  %v1193_v11 = vld [vmem:[#allocation2 + $0x38] sm:$0xff]   ;;  %v1194_v12 = vld [vmem:[#allocation2 + $0x40] sm:$0xff]   ;;  %s991_s2 = sshll.u32 %s1348_s20, 4  ;;  %s992_s2 = int_to_ptr.vmem [resolvable:$true] %s991_s2 }
  0x51   :  { %1083 = vmatprep.subr.bf16.mxu0 %v1346_v0  ;;  %1091 = vmatprep.subr.bf16.mxu1 %v1346_v0  ;;  %v1195_v13 = vld [vmem:[#allocation2 + $0x48] sm:$0xff]   ;;  %v1005_v14 = vld [vmem:[#allocation5] ss:$0 sm:$0xff]  ;;  %v1009_v15 = vld [vmem:[#allocation5 + $0x1] ss:$0 sm:$0xff]  ;;  %p1313_p5 = scmp.lt.s32.totalorder %s992_s2, %s992_s2 }
  0x52   :  { %v438_v17 = vld [vmem:[%s1636_s13] sm:$0xff]  ;;  %v1013_v35 = vld [vmem:[#allocation5 + $0x2] ss:$0 sm:$0xff]  ;;  %v1017_v36 = vld [vmem:[#allocation5 + $0x3] ss:$0 sm:$0xff]  ;;  %s1308_s13 = scalar_lea.vmem %s992_s2, 256 }
  0x53   :  { %v439_v20 = vld [vmem:[%s1637_s14] sm:$0xff]  ;;  %v1021_v62 = vld [vmem:[#allocation5 + $0x4] ss:$0 sm:$0xff]  ;;  %p1309_p4 = scmp.ne.s32.totalorder %s992_s2, %s1308_s13  ;;  %p1314_p6 = scmp.lt.s32.totalorder %s1308_s13, %s1308_s13 }
  0x54   :  { %1084 = vmatpush3.bf16.msra.mxu0 %v1188_v3  ;;  %1092 = vmatpush3.bf16.msra.mxu1 %v1189_v4 }
  0x55   :  { %1097 = vmatprep.subr.bf16.mxu0 %v1346_v0  ;;  %1105 = vmatprep.subr.bf16.mxu1 %v1346_v0  ;;  %p1315_p7 = por %p1314_p6, %p1313_p5 }
  0x57   :  { %1086 = vmatmul.mubr.msk.bf16.vlgmr.msra.gmra.mrb[0].mxu0 %vm129_vm1, %v105_v7  ;;  %1094 = vmatmul.mubr.msk.bf16.vlgmr.msra.gmra.mrb[0].mxu1 %vm129_vm1, %v105_v7  ;;  %p1316_p8 = pnand %p1315_p7, %p1309_p4 }
  0x58   :  { %1098 = vmatpush3.bf16.msra.mxu0 %v1190_v8  ;;  %1106 = vmatpush3.bf16.msra.mxu1 %v1191_v9 }
  0x59   :  { %1099 = vmatprep.subr.bf16.mxu0 %v1346_v0  ;;  %1107 = vmatprep.subr.bf16.mxu1 %v1346_v0 }
  0x5a   :  { %1101 = vmatprep.mubr.msk.bf16.mxu0 %vm1347_vm0, %v1346_v0  ;;  %1109 = vmatprep.mubr.msk.bf16.mxu1 %vm1347_vm0, %v1346_v0 }
  0x5c   :  { %1100 = vmatpush3.bf16.msra.mxu0 %v1192_v10  ;;  %1108 = vmatpush3.bf16.msra.mxu1 %v1193_v11 }
  0x5d   :  { %1113 = vmatprep.subr.bf16.mxu0 %v1346_v0  ;;  %1121 = vmatprep.subr.bf16.mxu1 %v1346_v0 }
  0x5f   :  { %1102 = vmatmul.mubr.msk.bf16.vlgmr.msra.gmra.mrb[4].mxu0 %vm129_vm1, %v105_v7  ;;  %1110 = vmatmul.mubr.msk.bf16.vlgmr.msra.gmra.mrb[4].mxu1 %vm129_vm1, %v105_v7 }
  0x60   :  { %1117 = vmatprep.mubr.msk.bf16.mxu0 %vm1347_vm0, %v1346_v0  ;;  %1123 = vmatprep.mubr.msk.bf16.mxu1 %vm1347_vm0, %v1346_v0 }
  0x61   :  { %1114 = vmatpush3.bf16.msra.mxu0 %v1194_v12 }
  0x62   :  { %1115 = vmatprep.subr.bf16.mxu0 %v1346_v0 }
  0x65   :  { %1116 = vmatpush3.bf16.msra.mxu0 %v1195_v13 }
  0x66   :  { %1127 = vmatprep.subr.bf16.mxu0 %v1346_v0 }
  0x68   :  { %1118 = vmatmul.mubr.msk.bf16.vlgmr.msra.gmra.mrb[8].mxu0 %vm129_vm1, %v105_v7 }
  0x69   :  { %1129 = vmatprep.mubr.msk.bf16.mxu0 %vm1347_vm0, %v1346_v0 }
 0x12a   :  { %v167_v16 = vpop.f32.mrb[0].mxu0  ;;  %v233_v19 = vpop.f32.mrb[0].mxu1 }
 0x12b   :  { %v168_v18 = vadd.f32 %v1005_v14, %v167_v16  ;;  %v1087_v21 = vpop.f32.mrb[1].mxu0  ;;  %v234_v22 = vadd.f32 %v1009_v15, %v233_v19  ;;  %v1095_v23 = vpop.f32.mrb[1].mxu1 }
 0x12c   :  { %v170_v24 = vpop.f32.mrb[2].mxu0  ;;  %v236_v27 = vpop.f32.mrb[2].mxu1 }
 0x12d   :  { %v440_v25 = vmul.f32 %v438_v17, %v168_v18  ;;  %v171_v26 = vadd.f32 %v1005_v14, %v170_v24  ;;  %v1088_v28 = vpop.f32.mrb[3].mxu0  ;;  %v442_v29 = vmul.f32 %v439_v20, %v234_v22  ;;  %v237_v30 = vadd.f32 %v1009_v15, %v236_v27  ;;  %v1096_v31 = vpop.f32.mrb[3].mxu1 }
 0x12f   :  { %v441_v32 = vmul.f32 %v438_v17, %v171_v26  ;;  %v444_v33 = vadd.f32 %v442_v29, %v440_v25  ;;  %v443_v34 = vmul.f32 %v439_v20, %v237_v30 }
 0x131   :  { %v445_v37 = vadd.f32 %v443_v34, %v441_v32  ;;  %v452_v60 = vpack.c.bf16 %v444_v33, %v444_v33 }
 0x132   :  { %v299_v38 = vpop.f32.mrb[4].mxu0  ;;  %v365_v40 = vpop.f32.mrb[4].mxu1 }
 0x133   :  { %v300_v39 = vadd.f32 %v1013_v35, %v299_v38  ;;  %v1103_v41 = vpop.f32.mrb[5].mxu0  ;;  %v366_v42 = vadd.f32 %v1017_v36, %v365_v40  ;;  %v1111_v43 = vpop.f32.mrb[5].mxu1  ;;  %v453_v61 = vpack.c.bf16 %v445_v37, %v445_v37  ;;  %v1196_v40 = vld [vmem:[%s1626_s3] sm:$0xff]  }
 0x134   :  { %v302_v44 = vpop.f32.mrb[6].mxu0  ;;  %v368_v47 = vpop.f32.mrb[6].mxu1  ;;  %v1197_v41 = vld [vmem:[%s1626_s3 + $0x8] sm:$0xff]  }
 0x135   :  { %v446_v45 = vmul.f32 %v438_v17, %v300_v39  ;;  %v303_v46 = vadd.f32 %v1013_v35, %v302_v44  ;;  %v1104_v48 = vpop.f32.mrb[7].mxu0  ;;  %v448_v49 = vmul.f32 %v439_v20, %v366_v42  ;;  %v369_v50 = vadd.f32 %v1017_v36, %v368_v47  ;;  %v1112_v51 = vpop.f32.mrb[7].mxu1 }
 0x136   :  { %v1029_v51 = vld [vmem:[%s1627_s4] ss:$0 sm:$0xff] }
 0x137   :  { %v447_v52 = vmul.f32 %v438_v17, %v303_v46  ;;  %v450_v53 = vadd.f32 %v448_v49, %v446_v45  ;;  %v449_v54 = vmul.f32 %v439_v20, %v369_v50 }
 0x139   :  { %v454_v55 = vpack.c.bf16 %v450_v53, %v450_v53  ;;  %v451_v56 = vadd.f32 %v449_v54, %v447_v52 }
 0x13b   :  { %v455_v57 = vpack.c.bf16 %v451_v56, %v451_v56  ;;  %v460_v58 = vsel %vm129_vm1, %v454_v55, 0  ;;  %v431_v63 = vpop.f32.mrb[8].mxu0 }
 0x13c   :  { %1122 = vmatpush3.bf16.xpose.msra.mxu1 %v460_v58  ;;  %v432_v1 = vadd.f32 %v1021_v62, %v431_v63  ;;  %v1119_v2 = vpop.f32.mrb[9].mxu0 }
 0x13d   :  { %v506_v59 = vsel %vm129_vm1, %v455_v57, 0  ;;  %1133 = vmatprep.subr.bf16.mxu1 %v1346_v0  ;;  %v434_v3 = vpop.f32.mrb[10].mxu0 }
 0x13e   :  { %1128 = vmatpush3.bf16.xpose.msra.mxu0 %v506_v59  ;;  %v573_v4 = vpack.c.bf16 %v432_v1, %v432_v1  ;;  %v435_v7 = vadd.f32 %v1021_v62, %v434_v3  ;;  %v1120_v8 = vpop.f32.mrb[11].mxu0 }
 0x13f   :  { %1139 = vmatprep.subr.bf16.mxu0 %v1346_v0 }
 0x140   :  { %v580_v9 = vsel %vm578_vm2, %v573_v4, 0  ;;  %v574_v10 = vpack.c.bf16 %v435_v7, %v435_v7 }
 0x142   :  { %v626_v11 = vsel %vm578_vm2, %v574_v10, 0  ;;  %v1199_v10 = vld [vmem:[%s1630_s7 + $0x8] sm:$0xff]  }
 0x143   :  { %1124 = vmatmul.mubr.msk.bf16.vlgmr.msra.gmra.mrb[8].mxu1 %vm129_vm1, %v452_v60 }
 0x144   :  { %1135 = vmatprep.mubr.msk.bf16.mxu1 %vm1347_vm0, %v1346_v0  ;;  %1134 = vmatpush3.bf16.msra.mxu1 %v580_v9 }
 0x145   :  { %1130 = vmatmul.mubr.msk.bf16.vlgmr.msra.gmra.mrb[12].mxu0 %vm129_vm1, %v453_v61  ;;  %1145 = vmatprep.subr.bf16.mxu1 %v1346_v0 }
 0x146   :  { %1141 = vmatprep.mubr.msk.bf16.mxu0 %vm1347_vm0, %v1346_v0  ;;  %1140 = vmatpush3.bf16.msra.mxu0 %v626_v11  ;;  %v1200_v11 = vld [vmem:[%s1632_s9] sm:$0xff]  }
 0x147   :  { %1153 = vmatprep.subr.bf16.mxu0 %v1346_v0 }
 0x216   :  { %v496_v12 = vpop.f32.mrb[8].mxu1 }
 0x217   :  { %v1125_v13 = vpop.f32.mrb[9].mxu1  ;;  %v549_v14 = vsel %vm548_vm3, %v496_v12, -inf }
 0x218   :  { %550 = vmax.xlane.f32.xlu0 %v549_v14  ;;  %v499_v15 = vpop.f32.mrb[10].mxu1  ;;  %v542_v16 = vpop.f32.mrb[12].mxu0 }
 0x219   :  { %v1126_v17 = vpop.f32.mrb[11].mxu1  ;;  %v1131_v18 = vpop.f32.mrb[13].mxu0  ;;  %v552_v21 = vsel %vm548_vm3, %v542_v16, -inf }
 0x21a   :  { %v545_v19 = vpop.f32.mrb[14].mxu0 }
 0x21b   :  { %v1132_v20 = vpop.f32.mrb[15].mxu0 }
 0x21c   :  { %553 = vmax.xlane.f32.xlu0 %v552_v21  ;;  %v1033_v20 = vld [vmem:[%s1628_s5] ss:$0 sm:$0xff] }
 0x2a5   :  { %v551_v22 = vpop.xlane.xlu0 %550 }
 0x2a6   :  { %v555_v23 = vsub.f32 %v496_v12, %v551_v22  ;;  %v1201_v12 = vld [vmem:[%s1632_s9 + $0x8] sm:$0xff]  }
 0x2a8   :  { %v557_v24 = vmul.f32 1.442695, %v555_v23 }
 0x2a9   :  { %v554_v25 = vpop.xlane.xlu0 %553 }
 0x2aa   :  { %1204 = vpow2.f32 %v557_v24  ;;  %v556_v26 = vsub.f32 %v542_v16, %v554_v25  ;;  %v1034_v25 = vld [vmem:[#allocation7] ss:$0 sm:$0xff] }
 0x2ac   :  { %v559_v27 = vmul.f32 1.442695, %v556_v26 }
 0x2ae   :  { %1206 = vpow2.f32 %v559_v27 }
 0x2b4   :  { %v1205_v28 = vpop.eup %1204 }
 0x2b5   :  { %v561_v29 = vsel %vm548_vm3, %v1205_v28, 0.0 }
 0x2b6   :  { %562 = vadd.xlane.f32.xlu1 %v561_v29 }
 0x2b8   :  { %v1207_v30 = vpop.eup %1206 }
 0x2b9   :  { %v564_v31 = vsel %vm548_vm3, %v1207_v30, 0.0 }
 0x2ba   :  { %565 = vadd.xlane.f32.xlu1 %v564_v31  ;;  %v1203_v31 = vld [vmem:[%s1632_s9 + $0x18] sm:$0xff]  }
 0x343   :  { %v563_v32 = vpop.xlane.xlu1 %562 }
 0x344   :  { %1208 = vrcp.f32 %v563_v32  ;;  %v1035_v32 = vld [vmem:[#allocation8] ss:$0 sm:$0xff] }
 0x347   :  { %v566_v33 = vpop.xlane.xlu1 %565 }
 0x348   :  { %1210 = vrcp.f32 %v566_v33 }
 0x34e   :  { %v1209_v34 = vpop.eup %1208 }
 0x34f   :  { %v569_v35 = vmul.f32 %v1209_v34, %v1205_v28 }
 0x351   :  { %v571_v36 = vpack.c.bf16 %v569_v35, %v569_v35 }
 0x352   :  { %v1211_v37 = vpop.eup %1210 }
 0x353   :  { %v570_v38 = vmul.f32 %v1211_v37, %v1207_v30  ;;  %1136 = vmatmul.mubr.msk.bf16.vlgmr.msra.gmra.mrb[12].mxu1 %vm548_vm3, %v571_v36  ;;  %v1202_v30 = vld [vmem:[%s1632_s9 + $0x10] sm:$0xff]  }
 0x354   :  { %1149 = vmatprep.mubr.msk.bf16.mxu1 %vm1347_vm0, %v1346_v0  ;;  %1146 = vmatpush3.bf16.msra.mxu1 %v1196_v40 }
 0x355   :  { %v572_v39 = vpack.c.bf16 %v570_v38, %v570_v38  ;;  %1147 = vmatprep.subr.bf16.mxu1 %v1346_v0 }
 0x357   :  { %1142 = vmatmul.mubr.msk.bf16.vlgmr.msra.gmra.mrb[16].mxu0 %vm548_vm3, %v572_v39 }
 0x358   :  { %1157 = vmatprep.mubr.msk.bf16.mxu0 %vm1347_vm0, %v1346_v0  ;;  %1148 = vmatpush3.bf16.msra.mxu1 %v1197_v41 }
 0x359   :  { %1161 = vmatprep.subr.bf16.mxu1 %v1346_v0 }
 0x426   :  { %v616_v42 = vpop.f32.mrb[12].mxu1 }
 0x427   :  { %v1137_v43 = vpop.f32.mrb[13].mxu1 }
 0x428   :  { %v619_v44 = vpop.f32.mrb[14].mxu1 }
 0x429   :  { %v1138_v45 = vpop.f32.mrb[15].mxu1 }
 0x42a   :  { %v662_v46 = vpop.f32.mrb[16].mxu0 }
 0x42b   :  { %v668_v47 = vpack.c.bf16 %v662_v46, %v616_v42  ;;  %v1143_v48 = vpop.f32.mrb[17].mxu0 }
 0x42c   :  { %v665_v49 = vpop.f32.mrb[18].mxu0 }
 0x42d   :  { %v1144_v50 = vpop.f32.mrb[19].mxu0  ;;  %1150 = vmatmul.mubr.msk.bf16.vlgmr.msra.gmra.mrb[16].mxu1 %vm129_vm1, %v668_v47 }
 0x42e   :  { %1169 = vmatprep.mubr.msk.bf16.mxu1 %vm1347_vm0, %v1346_v0  ;;  %1162 = vmatpush3.bf16.msra.mxu1 %v1200_v11 }
 0x42f   :  { %1163 = vmatprep.subr.bf16.mxu1 %v1346_v0 }
 0x432   :  { %1164 = vmatpush3.bf16.msra.mxu1 %v1201_v12 }
 0x433   :  { %1165 = vmatprep.subr.bf16.mxu1 %v1346_v0 }
 0x436   :  { %1166 = vmatpush3.bf16.msra.mxu1 %v1202_v30 }
 0x437   :  { %1167 = vmatprep.subr.bf16.mxu1 %v1346_v0 }
 0x43a   :  { %1168 = vmatpush3.bf16.msra.mxu1 %v1203_v31 }
 0x500   :  { %v729_v52 = vpop.f32.mrb[16].mxu1 }
 0x501   :  { %v730_v53 = vadd.f32 %v1029_v51, %v729_v52  ;;  %v1151_v54 = vpop.f32.mrb[17].mxu1 }
 0x502   :  { %v732_v55 = vpop.f32.mrb[18].mxu1 }
 0x503   :  { %v733_v56 = vadd.f32 %v1029_v51, %v732_v55  ;;  %v1152_v57 = vpop.f32.mrb[19].mxu1  ;;  %v736_v58 = vadd.f32 %v730_v53, %v1490_v5 }
 0x505   :  { %v740_v59 = vsel %vm129_vm1, %v736_v58, 0.0  ;;  %v737_v60 = vadd.f32 %v733_v56, %v1495_v6  ;;  %v1198_v6 = vld [vmem:[%s1630_s7] sm:$0xff]  }
 0x506   :  { %741 = vadd.xlane.f32.xlu0 %v740_v59  ;;  %1154 = vmatpush3.bf16.msra.mxu0 %v1198_v6  ;;  %v1046_v6 = vld [vmem:[%s1635_s12] ss:$0 sm:$0xff] }
 0x507   :  { %v743_v61 = vsel %vm129_vm1, %v737_v60, 0.0  ;;  %1155 = vmatprep.subr.bf16.mxu0 %v1346_v0  ;;  %v1039_v0 = vld [vmem:[%s1633_s10] ss:$0 sm:$0xff] }
 0x508   :  { %744 = vadd.xlane.f32.xlu1 %v743_v61 }
 0x50a   :  { %1156 = vmatpush3.bf16.msra.mxu0 %v1199_v10 }
 0x593   :  { %v742_v62 = vpop.xlane.xlu0 %741 }
 0x594   :  { %v747_v63 = vmul.f32 0.03125, %v742_v62 }
 0x595   :  { %v745_v1 = vpop.xlane.xlu1 %744 }
 0x596   :  { %v749_v2 = vsub.f32 %v736_v58, %v747_v63  ;;  %v748_v3 = vmul.f32 0.03125, %v745_v1 }
 0x598   :  { %v750_v4 = vsub.f32 %v737_v60, %v748_v3  ;;  %v751_v7 = vmul.f32 %v749_v2, %v749_v2 }
 0x59a   :  { %v753_v8 = vsel %vm129_vm1, %v751_v7, 0.0  ;;  %v752_v9 = vmul.f32 %v750_v4, %v750_v4 }
 0x59b   :  { %754 = vadd.xlane.f32.xlu0 %v753_v8  ;;  %v1045_v8 = vld [vmem:[%s1634_s11] ss:$0 sm:$0xff] }
 0x59c   :  { %v756_v5 = vsel %vm129_vm1, %v752_v9, 0.0 }
 0x59d   :  { %757 = vadd.xlane.f32.xlu1 %v756_v5 }
 0x628   :  { %v755_v13 = vpop.xlane.xlu0 %754 }
 0x629   :  { %v759_v14 = vmul.f32 0.03125, %v755_v13 }
 0x62a   :  { %v758_v15 = vpop.xlane.xlu1 %757 }
 0x62b   :  { %v761_v16 = vadd.f32 1e-05, %v759_v14  ;;  %v760_v17 = vmul.f32 0.03125, %v758_v15 }
 0x62d   :  { %1212 = vrsqrt.f32 %v761_v16  ;;  %v762_v18 = vadd.f32 1e-05, %v760_v17 }
 0x62f   :  { %1214 = vrsqrt.f32 %v762_v18 }
 0x637   :  { %v1213_v19 = vpop.eup %1212 }
 0x638   :  { %v765_v21 = vmul.f32 %v1213_v19, %v749_v2 }
 0x639   :  { %v1215_v22 = vpop.eup %1214 }
 0x63a   :  { %v773_v23 = vmul.f32 %v1033_v20, %v765_v21  ;;  %v766_v24 = vmul.f32 %v1215_v22, %v750_v4 }
 0x63c   :  { %v774_v26 = vmul.f32 %v1033_v20, %v766_v24  ;;  %v781_v27 = vadd.f32 %v1034_v25, %v773_v23 }
 0x63e   :  { %v782_v28 = vadd.f32 %v1034_v25, %v774_v26 }
 0x640   :  { %v783_v29 = vpack.c.bf16 %v782_v28, %v781_v27 }
 0x642   :  { %1158 = vmatmul.mubr.msk.bf16.vlgmr.msra.gmra.mrb[20].mxu0 %vm129_vm1, %v783_v29 }
 0x715   :  { %v844_v33 = vpop.f32.mrb[20].mxu0 }
 0x716   :  { %v845_v34 = vadd.f32 %v1035_v32, %v844_v33  ;;  %v1159_v35 = vpop.f32.mrb[21].mxu0 }
 0x717   :  { %v847_v36 = vpop.f32.mrb[22].mxu0 }
 0x718   :  { %v848_v37 = vadd.f32 %v1035_v32, %v847_v36  ;;  %v1160_v38 = vpop.f32.mrb[23].mxu0  ;;  %v851_v39 = vmax.f32 %v845_v34, 0.0 }
 0x71a   :  { %v852_v40 = vmax.f32 %v848_v37, 0.0 }
 0x71c   :  { %v853_v41 = vpack.c.bf16 %v852_v40, %v851_v39 }
 0x71e   :  { %1170 = vmatmul.mubr.msk.bf16.vlgmr.msra.gmra.mrb[20].mxu1 %vm893_vm4, %v853_v41 }
 0x7f1   :  { %v931_v42 = vpop.f32.mrb[20].mxu1 }
 0x7f2   :  { %v932_v43 = vadd.f32 %v1039_v0, %v931_v42  ;;  %v1171_v44 = vpop.f32.mrb[21].mxu1 }
 0x7f3   :  { %v934_v45 = vpop.f32.mrb[22].mxu1 }
 0x7f4   :  { %v935_v46 = vadd.f32 %v1039_v0, %v934_v45  ;;  %v1172_v47 = vpop.f32.mrb[23].mxu1  ;;  %v938_v48 = vadd.f32 %v932_v43, %v781_v27 }
 0x7f6   :  { %v942_v49 = vsel %vm129_vm1, %v938_v48, 0.0  ;;  %v939_v50 = vadd.f32 %v935_v46, %v782_v28 }
 0x7f7   :  { %943 = vadd.xlane.f32.xlu0 %v942_v49 }
 0x7f8   :  { %v945_v51 = vsel %vm129_vm1, %v939_v50, 0.0 }
 0x7f9   :  { %946 = vadd.xlane.f32.xlu1 %v945_v51 }
 0x884   :  { %v944_v52 = vpop.xlane.xlu0 %943 }
 0x885   :  { %v948_v53 = vmul.f32 0.03125, %v944_v52 }
 0x886   :  { %v947_v54 = vpop.xlane.xlu1 %946 }
 0x887   :  { %v950_v55 = vsub.f32 %v938_v48, %v948_v53  ;;  %v949_v56 = vmul.f32 0.03125, %v947_v54 }
 0x889   :  { %v951_v57 = vsub.f32 %v939_v50, %v949_v56  ;;  %v952_v58 = vmul.f32 %v950_v55, %v950_v55 }
 0x88b   :  { %v954_v59 = vsel %vm129_vm1, %v952_v58, 0.0  ;;  %v953_v60 = vmul.f32 %v951_v57, %v951_v57 }
 0x88c   :  { %955 = vadd.xlane.f32.xlu0 %v954_v59 }
 0x88d   :  { %v957_v61 = vsel %vm129_vm1, %v953_v60, 0.0 }
 0x88e   :  { %958 = vadd.xlane.f32.xlu1 %v957_v61 }
 0x919   :  { %v956_v62 = vpop.xlane.xlu0 %955 }
 0x91a   :  { %v960_v63 = vmul.f32 0.03125, %v956_v62 }
 0x91b   :  { %v959_v1 = vpop.xlane.xlu1 %958 }
 0x91c   :  { %v962_v2 = vadd.f32 1e-05, %v960_v63  ;;  %v961_v3 = vmul.f32 0.03125, %v959_v1 }
 0x91e   :  { %1216 = vrsqrt.f32 %v962_v2  ;;  %v963_v4 = vadd.f32 1e-05, %v961_v3 }
 0x920   :  { %1218 = vrsqrt.f32 %v963_v4 }
 0x928   :  { %v1217_v7 = vpop.eup %1216 }
 0x929   :  { %v966_v9 = vmul.f32 %v1217_v7, %v950_v55 }
 0x92a   :  { %v1219_v5 = vpop.eup %1218 }
 0x92b   :  { %v974_v10 = vmul.f32 %v1045_v8, %v966_v9  ;;  %v967_v11 = vmul.f32 %v1219_v5, %v951_v57 }
 0x92d   :  { %v975_v12 = vmul.f32 %v1045_v8, %v967_v11  ;;  %v982_v13 = vadd.f32 %v1046_v6, %v974_v10 }
 0x92f   :  { %v983_v14 = vadd.f32 %v1046_v6, %v975_v12  ;;  %984 = vst.msk [vmem:[#allocation10] sm:$0xff] %vm129_vm1, %v982_v13 }
 0x931   :  { %985 = vst.msk [vmem:[#allocation10 + $0x8] sm:$0xff] %vm129_vm1, %v983_v14 }
 0x932   :  { %1319 = shalt.err (!%p1316_p8)
}
 0x933   :  { %s1320_s14 = scalar_lea.hbm %s1638_s15, 256 }
 0x934   :  { %p1321_p9 = scmp.ne.s32.totalorder %s1638_s15, %s1320_s14  ;;  %p1324_p10 = scmp.lt.u32.totalorder %s1320_s14, %s1638_s15 }
 0x936   :  { %p1326_p11 = pnand %p1324_p10, %p1321_p9 }
 0x938   :  { %1329 = shalt.err (!%p1326_p11)
}
 0x939   :  { %s1349_s3 = smov 128   ;;  %s1350_s4 = smov 8  }
 0x93a   :  { %997 = dma.vmem_to_hbm [thread:$0]  %s992_s2, 256, %s1638_s15, [#allocation4], %s1349_s3, %s1349_s3, %s1350_s4  }
 0x93b   :  { %1336 = dma.done.wait [#allocation4], 256  }
 0x93c   :  { %1337 = vsyncadd [#allocation4], 4294967040 }
 0x93d   :  { %1001 = vsyncpa [#allocation3], 1 }
 0x93e   :  { %1002 = vsyncpa [#allocation6], 1 }
 0x93f   :  { %1003 = vsyncpa [#allocation9], 1 }
 0x940   :  { %1004 = vsyncpa [#allocation4], 1 }

</bundles_post_ra>
